<compile_context>
chip_gen: v7x
topology: tpu7x:2x2x1
jax: 0.10.0
libtpu: 0.0.40
codegen_flags: <defaults>
</compile_context>

<pallas_src>
import functools
from types import SimpleNamespace

import numpy as np
import jax
import jax.numpy as jnp
from jax.experimental import pallas as pl
from jax.experimental.pallas import tpu as pltpu


def _round_up(x, m):
    return (x + m - 1) // m * m


# ----------------------------- Pallas kernel ------------------------------ #
def _fused_forward_kernel(*refs, relu_flags, bias_slices):
    """refs = (x_ref, w0, ..., w_{L-1}, bias_all_ref, o_ref).

    One fused chain of MXU matmuls over a (TM, features) batch tile.  The
    activation never leaves VMEM/vregs; bf16 operands, f32 accumulation,
    f32 bias/ReLU epilogues.
    """
    x_ref = refs[0]
    o_ref = refs[-1]
    b_ref = refs[-2]
    w_refs = refs[1:-2]
    n_layers = len(relu_flags)

    act = x_ref[...]                                        # bf16 (TM, F), pre-cast in wrapper
    for i in range(n_layers):
        w = w_refs[i][...]                                  # bf16 (K, N)
        off, n = bias_slices[i]                             # static, 128-aligned offset
        y = jnp.dot(act, w, preferred_element_type=jnp.float32)   # MXU, f32 acc
        y = y + b_ref[:, off:off + n]                       # f32 epilogue (VPU)
        if relu_flags[i]:
            y = jnp.maximum(y, 0.0)
        if i + 1 < n_layers:
            act = y.astype(jnp.bfloat16)                    # single cast per layer
        else:
            act = y
    o_ref[...] = act.astype(o_ref.dtype)


def make_forward(weights, bias_concat, bias_slices, relu_flags, out_dim,
                 *, tm_max=256, out_dtype=jnp.float32):
    """Build a jitted forward that launches a single fused, batch-tiled pallas_call."""
    kernel = functools.partial(_fused_forward_kernel,
                               relu_flags=tuple(relu_flags),
                               bias_slices=tuple(bias_slices))
    feat = weights[0].shape[0]
    n_pad = weights[-1].shape[1]                 # lane-dense padded output width
    w_bytes = int(sum(w.size * w.dtype.itemsize for w in weights))
    b_bytes = int(bias_concat.size * bias_concat.dtype.itemsize)
    max_width = int(max(max(w.shape) for w in weights))

    def fwd(x):
        m = x.shape[0]
        assert x.shape[1] == feat, (x.shape, feat)
        m_pad = _round_up(max(m, 1), 8)
        if m_pad <= tm_max:
            tm = m_pad
        else:
            tm = tm_max
            m_pad = _round_up(m, tm)

        xb = x.astype(jnp.bfloat16)              # one cast, halves x DMA
        if m_pad != m:
            xb = jnp.pad(xb, ((0, m_pad - m), (0, 0)))

        args = [xb]
        in_specs = [pl.BlockSpec((tm, feat), lambda i: (i, 0))]
        for w in weights:
            args.append(w)
            in_specs.append(pl.BlockSpec(w.shape, lambda i: (0, 0)))   # resident
        args.append(bias_concat)
        in_specs.append(pl.BlockSpec(bias_concat.shape, lambda i: (0, 0)))

        flops = int(sum(2 * m_pad * w.shape[0] * w.shape[1] for w in weights))
        bytes_accessed = int(xb.size * 2 + w_bytes + b_bytes + m_pad * n_pad * 4)

        # VMEM budget: double-buffered x/out tiles + resident weights/bias +
        # in-kernel activation temporaries + slack.
        vmem_bytes = int(2 * (tm * feat * 2 + tm * n_pad * 4)
                         + 2 * w_bytes + 2 * b_bytes
                         + 4 * tm * max_width * 4
                         + (1 << 20))
        vmem_limit = min(max(vmem_bytes, 16 * 1024 * 1024), 64 * 1024 * 1024)

        out = pl.pallas_call(
            kernel,
            out_shape=jax.ShapeDtypeStruct((m_pad, n_pad), out_dtype),
            grid=(m_pad // tm,),
            in_specs=in_specs,
            out_specs=pl.BlockSpec((tm, n_pad), lambda i: (i, 0)),
            compiler_params=pltpu.CompilerParams(
                dimension_semantics=("parallel",),
                vmem_limit_bytes=vmem_limit),
            cost_estimate=pl.CostEstimate(
                flops=flops, transcendentals=0, bytes_accessed=bytes_accessed),
        )(*args)
        return out[:m, :out_dim]                 # strip batch pad + lane pad

    return jax.jit(fwd)


# --------------------------- parameter building --------------------------- #
def conv1d_as_matrix(weight, bias, stride, pad, l_in):
    """Dense (Cin*Lin, Cout*Lout) matrix for a PyTorch Conv1d on the flattened
    (C*L) activation.  weight: (Cout, Cin, K) (PyTorch layout)."""
    c_out, c_in, k = weight.shape
    l_out = (l_in + 2 * pad - k) // stride + 1
    w = np.asarray(weight, dtype=np.float32)
    mat = np.zeros((c_in * l_in, c_out * l_out), dtype=np.float32)
    for oc in range(c_out):
        for t in range(l_out):
            for j in range(k):
                i = t * stride - pad + j
                if 0 <= i < l_in:
                    mat[np.arange(c_in) * l_in + i, oc * l_out + t] += w[oc, :, j]
    b_full = np.repeat(np.asarray(bias, dtype=np.float32), l_out)
    return mat, b_full, l_out


def init_raw_layers(key, flags, spec_len):
    """Per-layer affine maps (f32 numpy) + relu flags mirroring Backward.forward."""
    layers = []                                   # (W (K,N), b (N,), relu)
    eps = 1e-5

    # --- Conv1d stack, then trailing Conv1d(in_ch, 1, k=1, s=1, p=0) ---
    conv_cfg = list(zip(flags.conv_out_channel_b, flags.conv_kernel_size_b,
                        flags.conv_stride_b))
    if conv_cfg:
        conv_cfg.append((1, 1, 1))
    l_cur, in_ch = spec_len, 1
    for out_ch, ksz, stride in conv_cfg:
        pad = int(ksz / 2 - 1) if stride == 2 else int((ksz - 1) / 2)
        key, k1, k2 = jax.random.split(key, 3)
        fan_in = in_ch * ksz
        w = np.asarray(jax.random.normal(k1, (out_ch, in_ch, ksz), jnp.float32)) / np.sqrt(fan_in)
        b = np.asarray(jax.random.normal(k2, (out_ch,), jnp.float32)) * 0.01
        mat, b_full, l_out = conv1d_as_matrix(w, b, stride, pad, l_cur)
        layers.append((mat, b_full, False))       # no activation inside the conv stack
        l_cur, in_ch = l_out, out_ch
    assert l_cur == flags.linear_b[0], (l_cur, flags.linear_b[0])

    # --- Linear + BatchNorm1d + ReLU stack; last Linear plain ---
    n_lin = len(flags.linear_b) - 1
    for ind in range(n_lin):
        fin, fout = flags.linear_b[ind], flags.linear_b[ind + 1]
        key, k1, k2 = jax.random.split(key, 3)
        w = np.asarray(jax.random.normal(k1, (fin, fout), jnp.float32)) / np.sqrt(fin)
        b = np.asarray(jax.random.normal(k2, (fout,), jnp.float32)) * 0.01
        if ind != n_lin - 1:
            # BatchNorm1d at PyTorch defaults, folded (inference mode).
            gamma = np.ones(fout, np.float32)
            beta = np.zeros(fout, np.float32)
            rmean = np.zeros(fout, np.float32)
            rvar = np.ones(fout, np.float32)
            scale = gamma / np.sqrt(rvar + eps)
            shift = beta - rmean * scale
            layers.append((w * scale[None, :], b * scale + shift, True))
        else:
            layers.append((w, b, False))
    return layers, flags.linear_b[-1]


def collapse_affine_runs(layers):
    """Compose every maximal ReLU-free run of affine layers into one affine map.

    Done in f64 numpy at init (single rounding to bf16 later), so the O(L^2)
    dense conv matrices and the first Linear collapse into one device matmul.
    """
    out = []
    cw, cb = None, None
    for w, b, relu in layers:
        if cw is None:
            cw, cb = w.astype(np.float64), b.astype(np.float64)
        else:
            cb = cb @ w + b
            cw = cw @ w
        if relu:
            out.append((cw.astype(np.float32), cb.astype(np.float32), True))
            cw, cb = None, None
    if cw is not None:
        out.append((cw.astype(np.float32), cb.astype(np.float32), False))
    return out


def pack_for_kernel(collapsed, out_dim):
    """Device operands: bf16 weights (last one zero-padded to a 128-multiple of
    columns for lane-dense stores), one concatenated f32 bias row with
    128-aligned per-layer offsets, relu flags, and the static bias slices."""
    assert collapsed[-1][0].shape[1] == out_dim
    weights, relu_flags, bias_chunks, bias_slices = [], [], [], []
    off = 0
    n_layers = len(collapsed)
    for i, (w, b, relu) in enumerate(collapsed):
        if i == n_layers - 1:
            n_pad = _round_up(w.shape[1], 128)
            if n_pad != w.shape[1]:
                w = np.pad(w, ((0, 0), (0, n_pad - w.shape[1])))
                b = np.pad(b, (0, n_pad - b.shape[0]))
        n = w.shape[1]
        weights.append(jnp.asarray(w, jnp.bfloat16))
        relu_flags.append(bool(relu))
        chunk = _round_up(n, 128)
        bc = np.zeros(chunk, np.float32)
        bc[:n] = b
        bias_chunks.append(bc)
        bias_slices.append((off, n))
        off += chunk
    bias_concat = jnp.asarray(np.concatenate(bias_chunks)[None, :], jnp.float32)
    return weights, bias_concat, tuple(bias_slices), tuple(relu_flags)


# ------------------------------ reference ---------------------------------- #
def reference_forward(x, raw_layers):
    """Full-precision f32 reference over the UNCOLLAPSED per-layer chain."""
    act = np.asarray(x, np.float32)
    for w, b, relu in raw_layers:
        act = act @ w + b
        if relu:
            act = np.maximum(act, 0.0)
    return act


if __name__ == "__main__":
    # Small Backward config: 64-d spectrum -> conv stack -> 32-d -> FCs -> 8-d geometry
    flags = SimpleNamespace(
        linear_b=[32, 32, 32, 8],
        conv_out_channel_b=[4, 4],
        conv_kernel_size_b=[4, 3],
        conv_stride_b=[2, 1],
    )
    spec_len = 64
    batch = 8

    key = jax.random.PRNGKey(0)
    key, k_in = jax.random.split(key)
    S = jax.random.normal(k_in, (batch, spec_len), jnp.float32)

    raw_layers, out_dim = init_raw_layers(key, flags, spec_len)
    collapsed = collapse_affine_runs(raw_layers)
    weights, bias_concat, bias_slices, relu_flags = pack_for_kernel(collapsed, out_dim)

    fwd = make_forward(weights, bias_concat, bias_slices, relu_flags, out_dim)
    G = jax.block_until_ready(fwd(S))
    assert G.shape == (batch, out_dim), G.shape
    assert bool(jnp.all(jnp.isfinite(G)))

    G_ref = reference_forward(np.asarray(S), raw_layers)
    np.testing.assert_allclose(np.asarray(G), G_ref, rtol=2e-2, atol=2e-2)

    print("KERNEL_OK")
</pallas_src>

<mosaic_0001>
module attributes {stable_mosaic.version = 11 : i64} {
  func.func @_fused_forward_kernel(%arg0: i32, %arg1: memref<8x64xbf16, #tpu.memory_space<vmem>>, %arg2: memref<64x32xbf16, #tpu.memory_space<vmem>>, %arg3: memref<32x32xbf16, #tpu.memory_space<vmem>>, %arg4: memref<32x128xbf16, #tpu.memory_space<vmem>>, %arg5: memref<1x384xf32, #tpu.memory_space<vmem>>, %arg6: memref<8x128xf32, #tpu.memory_space<vmem>>) attributes {dimension_semantics = [#tpu.dimension_semantics<parallel>], iteration_bounds = array<i64: 1>, scalar_prefetch = 0 : i64, scratch_operands = 0 : i64, tpu.core_type = #tpu.core_type<tc>, window_params = [{transform_indices = @transform_0, window_bounds = array<i64: 8, 64>}, {pipeline_mode = #tpu.pipeline_mode<synchronous>, transform_indices = @transform_1, window_bounds = array<i64: 64, 32>}, {pipeline_mode = #tpu.pipeline_mode<synchronous>, transform_indices = @transform_2, window_bounds = array<i64: 32, 32>}, {pipeline_mode = #tpu.pipeline_mode<synchronous>, transform_indices = @transform_3, window_bounds = array<i64: 32, 128>}, {pipeline_mode = #tpu.pipeline_mode<synchronous>, transform_indices = @transform_4, window_bounds = array<i64: 1, 384>}, {transform_indices = @transform_5, window_bounds = array<i64: 8, 128>}]} {
    %c0 = arith.constant 0 : index
    %c0_0 = arith.constant 0 : index
    %0 = vector.load %arg1[%c0, %c0_0] : memref<8x64xbf16, #tpu.memory_space<vmem>>, vector<8x64xbf16>
    %c0_1 = arith.constant 0 : index
    %c0_2 = arith.constant 0 : index
    %1 = vector.load %arg2[%c0_1, %c0_2] : memref<64x32xbf16, #tpu.memory_space<vmem>>, vector<64x32xbf16>
    %cst = arith.constant dense<0.000000e+00> : vector<8x32xf32>
    %2 = tpu.matmul %0, %1, %cst {dimension_numbers = #tpu.dot_dimension_numbers<[1], [0], [0], [1], [0, 0, 1, 1], [], []>} : vector<8x64xbf16>, vector<64x32xbf16>, vector<8x32xf32> -> vector<8x32xf32>
    %c0_3 = arith.constant 0 : index
    %c0_4 = arith.constant 0 : index
    %3 = vector.load %arg5[%c0_3, %c0_4] : memref<1x384xf32, #tpu.memory_space<vmem>>, vector<1x32xf32>
    %4 = vector.broadcast %3 : vector<1x32xf32> to vector<8x32xf32>
    %5 = arith.addf %2, %4 : vector<8x32xf32>
    %cst_5 = arith.constant 0.000000e+00 : f32
    %6 = vector.broadcast %cst_5 : f32 to vector<8x32xf32>
    %7 = arith.maximumf %5, %6 : vector<8x32xf32>
    %8 = arith.truncf %7 : vector<8x32xf32> to vector<8x32xbf16>
    %c0_6 = arith.constant 0 : index
    %c0_7 = arith.constant 0 : index
    %9 = vector.load %arg3[%c0_6, %c0_7] : memref<32x32xbf16, #tpu.memory_space<vmem>>, vector<32x32xbf16>
    %cst_8 = arith.constant dense<0.000000e+00> : vector<8x32xf32>
    %10 = tpu.matmul %8, %9, %cst_8 {dimension_numbers = #tpu.dot_dimension_numbers<[1], [0], [0], [1], [0, 0, 1, 1], [], []>} : vector<8x32xbf16>, vector<32x32xbf16>, vector<8x32xf32> -> vector<8x32xf32>
    %c0_9 = arith.constant 0 : index
    %c128 = arith.constant 128 : index
    %11 = vector.load %arg5[%c0_9, %c128] : memref<1x384xf32, #tpu.memory_space<vmem>>, vector<1x32xf32>
    %12 = vector.broadcast %11 : vector<1x32xf32> to vector<8x32xf32>
    %13 = arith.addf %10, %12 : vector<8x32xf32>
    %cst_10 = arith.constant 0.000000e+00 : f32
    %14 = vector.broadcast %cst_10 : f32 to vector<8x32xf32>
    %15 = arith.maximumf %13, %14 : vector<8x32xf32>
    %16 = arith.truncf %15 : vector<8x32xf32> to vector<8x32xbf16>
    %c0_11 = arith.constant 0 : index
    %c0_12 = arith.constant 0 : index
    %17 = vector.load %arg4[%c0_11, %c0_12] : memref<32x128xbf16, #tpu.memory_space<vmem>>, vector<32x128xbf16>
    %cst_13 = arith.constant dense<0.000000e+00> : vector<8x128xf32>
    %18 = tpu.matmul %16, %17, %cst_13 {dimension_numbers = #tpu.dot_dimension_numbers<[1], [0], [0], [1], [0, 0, 1, 1], [], []>} : vector<8x32xbf16>, vector<32x128xbf16>, vector<8x128xf32> -> vector<8x128xf32>
    %c0_14 = arith.constant 0 : index
    %c256 = arith.constant 256 : index
    %19 = vector.load %arg5[%c0_14, %c256] : memref<1x384xf32, #tpu.memory_space<vmem>>, vector<1x128xf32>
    %20 = vector.broadcast %19 : vector<1x128xf32> to vector<8x128xf32>
    %21 = arith.addf %18, %20 : vector<8x128xf32>
    %c0_15 = arith.constant 0 : index
    %c0_16 = arith.constant 0 : index
    %22 = vector.load %arg6[%c0_15, %c0_16] : memref<8x128xf32, #tpu.memory_space<vmem>>, vector<8x128xf32>
    tpu.vector_store %arg6[%c0_15, %c0_16], %21 {strides = array<i32>} : memref<8x128xf32, #tpu.memory_space<vmem>>, vector<8x128xf32>,
    return
  }
  func.func @transform_0(%arg0: i32) -> (i32, i32) {
    %c0_i32 = arith.constant 0 : i32
    %c0_i32_0 = arith.constant 0 : i32
    return %arg0, %c0_i32 : i32, i32
  }
  func.func @transform_1(%arg0: i32) -> (i32, i32) {
    %c0_i32 = arith.constant 0 : i32
    %c0_i32_0 = arith.constant 0 : i32
    %c0_i32_1 = arith.constant 0 : i32
    return %c0_i32, %c0_i32_0 : i32, i32
  }
  func.func @transform_2(%arg0: i32) -> (i32, i32) {
    %c0_i32 = arith.constant 0 : i32
    %c0_i32_0 = arith.constant 0 : i32
    %c0_i32_1 = arith.constant 0 : i32
    return %c0_i32, %c0_i32_0 : i32, i32
  }
  func.func @transform_3(%arg0: i32) -> (i32, i32) {
    %c0_i32 = arith.constant 0 : i32
    %c0_i32_0 = arith.constant 0 : i32
    %c0_i32_1 = arith.constant 0 : i32
    return %c0_i32, %c0_i32_0 : i32, i32
  }
  func.func @transform_4(%arg0: i32) -> (i32, i32) {
    %c0_i32 = arith.constant 0 : i32
    %c0_i32_0 = arith.constant 0 : i32
    %c0_i32_1 = arith.constant 0 : i32
    return %c0_i32, %c0_i32_0 : i32, i32
  }
  func.func @transform_5(%arg0: i32) -> (i32, i32) {
    %c0_i32 = arith.constant 0 : i32
    %c0_i32_0 = arith.constant 0 : i32
    return %arg0, %c0_i32 : i32, i32
  }
}

</mosaic_0001>

<bundles_post_ra>
// kernel: fwd.1
= control target key start
LH: loop header
LB: loop body
LE: loop exit
PB: predicated region body
PF: predicated region fallthrough
CT: control target
= control target key end

     0   :  { %10 = vsyncpa [#allocation3], 0  ;;  %s519_s0 = inlined_call_operand.vmem [shape: bf16[8,64], index: 0, kind: input, shape index: {}]   ;;  %s520_s1 = inlined_call_operand.hbm [shape: bf16[64,32], index: 1, kind: input, shape index: {}]   ;;  %s521_s2 = inlined_call_operand.vmem [shape: bf16[32,32], index: 2, kind: input, shape index: {}]   ;;  %s522_s3 = inlined_call_operand.vmem [shape: bf16[32,128], index: 3, kind: input, shape index: {}]   ;;  %s523_s4 = inlined_call_operand.hbm [shape: f32[1,384], index: 4, kind: input, shape index: {}]   ;;  %s524_s5 = inlined_call_operand.hbm [shape: f32[8,128], index: 5, kind: output, shape index: {}]  }
   0x1   :  { %11 = vsyncpa [#allocation6], 0 }
   0x2   :  { %12 = vsyncpa [#allocation4], 0  ;;  %s426_s18 = smov [#allocation2]   ;;  %s354_s22 = scalar_lea.hbm %s520_s1, 512 }
   0x3   :  { %s20_s19 = sshll.u32 %s426_s18, 4  ;;  %p355_p0 = scmp.ne.s32.totalorder %s520_s1, %s354_s22  ;;  %s21_s19 = int_to_ptr.vmem [resolvable:$true] %s20_s19 }
   0x4   :  { %p358_p1 = scmp.lt.u32.totalorder %s354_s22, %s520_s1 }
   0x6   :  { %p360_p2 = pnand %p358_p1, %p355_p0 }
   0x8   :  { %363 = shalt.err (!%p360_p2)
}
   0x9   :  { %s364_s27 = scalar_lea.vmem %s21_s19, 512  ;;  %p369_p4 = scmp.lt.s32.totalorder %s21_s19, %s21_s19 }
   0xa   :  { %p365_p3 = scmp.ne.s32.totalorder %s21_s19, %s364_s27  ;;  %p370_p5 = scmp.lt.s32.totalorder %s364_s27, %s364_s27 }
   0xc   :  { %p371_p6 = por %p370_p5, %p369_p4 }
   0xe   :  { %p372_p7 = pnand %p371_p6, %p365_p3 }
  0x10   :  { %375 = shalt.err (!%p372_p7)
}
  0x11   :  { %s427_s28 = smov 64   ;;  %s428_s29 = smov 4  }
  0x12   :  { %26 = dma.hbm_to_vmem [thread:$0]  %s520_s1, 512, %s21_s19, [#allocation3], %s427_s28, %s427_s28, %s428_s29  }
  0x13   :  { %s429_s7 = smov [#allocation5]   ;;  %s376_s11 = scalar_lea.hbm %s523_s4, 48 }
  0x14   :  { %s37_s8 = sshll.u32 %s429_s7, 4  ;;  %p377_p8 = scmp.ne.s32.totalorder %s523_s4, %s376_s11  ;;  %s38_s8 = int_to_ptr.vmem [resolvable:$true] %s37_s8 }
  0x15   :  { %p380_p9 = scmp.lt.u32.totalorder %s376_s11, %s523_s4 }
  0x17   :  { %p382_p10 = pnand %p380_p9, %p377_p8 }
  0x19   :  { %385 = shalt.err (!%p382_p10)
}
  0x1a   :  { %s386_s16 = scalar_lea.vmem %s38_s8, 48  ;;  %s390_s1 = scalar_lea.vmem %s38_s8, 64 }
  0x1b   :  { %p387_p11 = scmp.ne.s32.totalorder %s38_s8, %s386_s16  ;;  %p391_p12 = scmp.lt.s32.totalorder %s38_s8, %s38_s8 }
  0x1c   :  { %p392_p13 = scmp.lt.s32.totalorder %s390_s1, %s386_s16 }
  0x1e   :  { %p393_p0 = por %p392_p13, %p391_p12 }
  0x20   :  { %p394_p1 = pnand %p393_p0, %p387_p11 }
  0x22   :  { %397 = shalt.err (!%p394_p1)
}
  0x23   :  { %40 = dma.hbm_to_vmem [thread:$0]  %s523_s4, 48, %s38_s8, [#allocation6]  }
  0x24   :  { %420 = dma.done.wait [#allocation3], 512  }
  0x25   :  { %421 = vsyncadd [#allocation3], 4294966784 }
  0x26   :  { %422 = dma.done.wait [#allocation6], 48  }
  0x27   :  { %423 = vsyncadd [#allocation6], 4294967248  ;;  %v430_v0 = vmov 0.0   ;;  %vm431_vm0 = vmmov 0   ;;  %v346_v1 = vld [vmem:[#allocation2] sm:$0xff]   ;;  %v347_v2 = vld [vmem:[#allocation2 + $0x8] sm:$0xff]  }
  0x28   :  { %311 = vmatprep.subr.bf16.mxu0 %v430_v0  ;;  %319 = vmatprep.mubr.msk.bf16.mxu0 %vm431_vm0, %v430_v0  ;;  %v348_v3 = vld [vmem:[#allocation2 + $0x10] sm:$0xff]   ;;  %v349_v4 = vld [vmem:[#allocation2 + $0x18] sm:$0xff]   ;;  %v48_v5 = vld [vmem:[%s519_s0] sm:$0xf]  ;;  %vm88_vm1 = vcmask 523264   ;;  %vm157_vm2 = vcmask 261120  }
  0x29   :  { %323 = vmatprep.subr.bf16.mxu1 %v430_v0  ;;  %327 = vmatprep.mubr.msk.bf16.mxu1 %vm431_vm0, %v430_v0  ;;  %v350_v6 = vld [vmem:[%s521_s2] sm:$0xff]   ;;  %v351_v7 = vld [vmem:[%s521_s2 + $0x8] sm:$0xff]   ;;  %s432_s26 = smov [#allocation7]  }
  0x2a   :  { %312 = vmatpush3.bf16.msra.mxu0 %v346_v1  ;;  %324 = vmatpush3.bf16.msra.mxu1 %v350_v6  ;;  %v286_v8 = vld [vmem:[#allocation5] ss:$0 sm:$0xff]  ;;  %v353_v17 = vld [vmem:[%s522_s3 + $0x8] sm:$0xff]   ;;  %v292_v18 = vld [vmem:[#allocation5 + $0x1] ss:$0 sm:$0xff]  ;;  %s276_s27 = sshll.u32 %s432_s26, 4  ;;  %s277_s27 = int_to_ptr.vmem [resolvable:$true] %s276_s27 }
  0x2b   :  { %313 = vmatprep.subr.bf16.mxu0 %v430_v0  ;;  %325 = vmatprep.subr.bf16.mxu1 %v430_v0  ;;  %v352_v15 = vld [vmem:[%s522_s3] sm:$0xff]   ;;  %s398_s3 = scalar_lea.vmem %s277_s27, 128  ;;  %p403_p3 = scmp.lt.s32.totalorder %s277_s27, %s277_s27 }
  0x2c   :  { %v296_v26 = vld [vmem:[#allocation5 + $0x2] ss:$0 sm:$0xff]  ;;  %p399_p2 = scmp.ne.s32.totalorder %s277_s27, %s398_s3  ;;  %p404_p4 = scmp.lt.s32.totalorder %s398_s3, %s398_s3 }
  0x2e   :  { %314 = vmatpush3.bf16.msra.mxu0 %v347_v2  ;;  %326 = vmatpush3.bf16.msra.mxu1 %v351_v7  ;;  %p405_p5 = por %p404_p4, %p403_p3 }
  0x2f   :  { %315 = vmatprep.subr.bf16.mxu0 %v430_v0  ;;  %331 = vmatprep.subr.bf16.mxu1 %v430_v0 }
  0x30   :  { %p406_p6 = pnand %p405_p5, %p399_p2 }
  0x32   :  { %316 = vmatpush3.bf16.msra.mxu0 %v348_v3 }
  0x33   :  { %317 = vmatprep.subr.bf16.mxu0 %v430_v0 }
  0x36   :  { %318 = vmatpush3.bf16.msra.mxu0 %v349_v4 }
  0x39   :  { %320 = vmatmul.mubr.msk.bf16.vlgmr.msra.gmra.mrb[0].mxu0 %vm88_vm1, %v48_v5 }
 0x10c   :  { %v126_v9 = vpop.f32.mrb[0].mxu0 }
 0x10d   :  { %v127_v10 = vadd.f32 %v286_v8, %v126_v9  ;;  %v321_v11 = vpop.f32.mrb[1].mxu0 }
 0x10e   :  { %v129_v12 = vpop.f32.mrb[2].mxu0 }
 0x10f   :  { %v132_v13 = vmax.f32 %v127_v10, 0.0  ;;  %v322_v14 = vpop.f32.mrb[3].mxu0 }
 0x111   :  { %v133_v16 = vpack.c.bf16 %v132_v13, %v132_v13 }
 0x113   :  { %328 = vmatmul.mubr.msk.bf16.vlgmr.msra.gmra.mrb[0].mxu1 %vm157_vm2, %v133_v16 }
 0x114   :  { %332 = vmatpush3.bf16.msra.mxu1 %v352_v15  ;;  %335 = vmatprep.mubr.msk.bf16.mxu1 %vm431_vm0, %v430_v0 }
 0x115   :  { %333 = vmatprep.subr.bf16.mxu1 %v430_v0 }
 0x118   :  { %334 = vmatpush3.bf16.msra.mxu1 %v353_v17 }
 0x1e6   :  { %v195_v19 = vpop.f32.mrb[0].mxu1 }
 0x1e7   :  { %v196_v20 = vadd.f32 %v292_v18, %v195_v19  ;;  %v329_v21 = vpop.f32.mrb[1].mxu1 }
 0x1e8   :  { %v198_v22 = vpop.f32.mrb[2].mxu1 }
 0x1e9   :  { %v201_v23 = vmax.f32 %v196_v20, 0.0  ;;  %v330_v24 = vpop.f32.mrb[3].mxu1 }
 0x1eb   :  { %v202_v25 = vpack.c.bf16 %v201_v23, %v201_v23 }
 0x1ed   :  { %336 = vmatmul.mubr.msk.bf16.vlgmr.msra.gmra.mrb[4].mxu1 %vm157_vm2, %v202_v25 }
 0x2c0   :  { %v263_v27 = vpop.f32.mrb[4].mxu1 }
 0x2c1   :  { %v264_v28 = vadd.f32 %v296_v26, %v263_v27  ;;  %v337_v29 = vpop.f32.mrb[5].mxu1 }
 0x2c2   :  { %v266_v30 = vpop.f32.mrb[6].mxu1 }
 0x2c3   :  { %269 = vst [vmem:[#allocation7] sm:$0xff] %v264_v28  ;;  %v338_v31 = vpop.f32.mrb[7].mxu1 }
 0x2c4   :  { %409 = shalt.err (!%p406_p6)
}
 0x2c5   :  { %s410_s30 = scalar_lea.hbm %s524_s5, 128 }
 0x2c6   :  { %p411_p7 = scmp.ne.s32.totalorder %s524_s5, %s410_s30  ;;  %p414_p8 = scmp.lt.u32.totalorder %s410_s30, %s524_s5 }
 0x2c8   :  { %p416_p9 = pnand %p414_p8, %p411_p7 }
 0x2ca   :  { %419 = shalt.err (!%p416_p9)
}
 0x2cb   :  { %279 = dma.vmem_to_hbm [thread:$0]  %s277_s27, 128, %s524_s5, [#allocation4]  }
 0x2cc   :  { %424 = dma.done.wait [#allocation4], 128  }
 0x2cd   :  { %425 = vsyncadd [#allocation4], 4294967168 }
 0x2ce   :  { %283 = vsyncpa [#allocation3], 1 }
 0x2cf   :  { %284 = vsyncpa [#allocation6], 1 }
 0x2d0   :  { %285 = vsyncpa [#allocation4], 1 }

</bundles_post_ra>
